<compile_context>
chip_gen: v5e
topology: v5e:2x2
jax: 0.10.0
libtpu: 0.0.40
codegen_flags: <defaults>
</compile_context>

<pallas_src>
import functools

import jax
import jax.numpy as jnp
import numpy as np
from jax.experimental import pallas as pl
from jax.experimental.pallas import tpu as pltpu

_LANES = 128


def _focal_loss_kernel(x_ref, tgt_ref, alpha_ref, out_ref,
                       m_sc, s_sc, lse_sc, gx_sc, at_sc,
                       *, num_classes, tr, gamma, cache_rows):
    p = pl.program_id(0)          # 0: per-class logsumexp stats, 1: focal loss
    i = pl.program_id(1)          # row-tile index over the sample axis
    C = num_classes
    L = tgt_ref.shape[-1]
    neg_inf = jnp.float32(-jnp.inf)

    def gather_rows(tgt, x_f32):
        """x[tgt[m], m] and alpha[tgt[m]] as dense (tr, L) tiles via selects."""
        alpha_all = alpha_ref[...]                       # (C, L), lane-replicated
        gx = jnp.zeros((tr, L), jnp.float32)
        at = jnp.zeros((tr, L), jnp.float32)
        for c in range(C):                               # C is small and static
            sel = tgt == c
            gx = jnp.where(sel, x_f32[c], gx)
            at = jnp.where(sel, alpha_all[c:c + 1, :], at)
        return gx, at

    @pl.when(jnp.logical_and(p == 0, i == 0))
    def _init():
        m_sc[...] = jnp.full_like(m_sc, -jnp.inf)
        s_sc[...] = jnp.zeros_like(s_sc)

    @pl.when(p == 0)
    def _phase_stats():
        x = x_ref[...].astype(jnp.float32)               # (C, tr, L)
        # Online per-class, per-lane logsumexp (padding is -inf -> exp() = 0).
        tile_max = jnp.max(x, axis=1)                    # (C, L)
        m_new = jnp.maximum(m_sc[...], tile_max)
        m_safe = jnp.where(m_new == neg_inf, jnp.float32(0.0), m_new)
        s_sc[...] = (s_sc[...] * jnp.exp(m_sc[...] - m_safe)
                     + jnp.sum(jnp.exp(x - m_safe[:, None, :]), axis=1))
        m_sc[...] = m_new
        if cache_rows:
            # Gather x[tgt] / alpha[tgt] now so phase 1 never re-reads x.
            gx, at = gather_rows(tgt_ref[...], x)
            row0 = pl.multiple_of(i * tr, 8)
            gx_sc[pl.ds(row0, tr), :] = gx
            at_sc[pl.ds(row0, tr), :] = at

    @pl.when(p == 1)
    def _phase_loss():
        @pl.when(i == 0)
        def _combine_lse():
            # Fold the per-lane partials into one per-class logsumexp (hoisted).
            m_tot = jnp.max(m_sc[...], axis=1, keepdims=True)            # (C, 1)
            s_tot = jnp.sum(s_sc[...] * jnp.exp(m_sc[...] - m_tot),
                            axis=1, keepdims=True)                       # (C, 1)
            lse_sc[...] = jnp.broadcast_to(m_tot + jnp.log(s_tot), lse_sc.shape)
            out_ref[...] = jnp.zeros_like(out_ref)

        tgt = tgt_ref[...]                               # (tr, L); pad rows = -1
        lse_all = lse_sc[...]                            # (C, L)
        lse_g = jnp.zeros((tr, L), jnp.float32)
        for c in range(C):
            lse_g = jnp.where(tgt == c, lse_all[c:c + 1, :], lse_g)

        if cache_rows:
            row0 = pl.multiple_of(i * tr, 8)
            gx = gx_sc[pl.ds(row0, tr), :]
            at = at_sc[pl.ds(row0, tr), :]
        else:
            gx, at = gather_rows(tgt, x_ref[...].astype(jnp.float32))

        # Padded samples (tgt == -1) select nothing: gx = at = lse_g = 0, so
        # logpt = 0, pt = 1 and the loss term is exactly 0 -> no masking needed.
        logpt = gx - lse_g
        pt = jnp.exp(logpt)
        d = 1.0 - pt
        if float(gamma).is_integer() and gamma >= 0:
            focal = jnp.ones_like(d)
            for _ in range(int(gamma)):                  # pure VPU multiplies
                focal = focal * d
        else:
            focal = jnp.power(jnp.maximum(d, 0.0), jnp.float32(gamma))
        loss = -(focal * (logpt * at))                   # (tr, L), dense
        # Fold sublane groups into the tiny resident (8, L) accumulator.
        out_ref[...] += jnp.sum(loss.reshape(tr // 8, 8, L), axis=0)


def _round_up(v, m):
    return ((v + m - 1) // m) * m


def focal_loss(x, target, alpha=None, *, gamma=2, size_average=True,
               max_tile_bytes=1 << 20):
    """x: (N, C, H, W) float logits; target: (N, H, W) int class ids."""
    N, C, H, W = x.shape
    M = N * H * W
    L = _LANES
    itemsize = jnp.dtype(x.dtype).itemsize

    # Plain-JAX layout glue reproducing the module's view/transpose/view, then
    # transposed to (C, M) so the big sample axis lands on lanes/sublanes.
    xT = jnp.transpose(x.reshape(N, C, H * W), (1, 0, 2)).reshape(C, M)
    tgt_flat = target.reshape(M).astype(jnp.int32)

    # alpha handling mirrors FocalLoss.__init__.
    if alpha is None:
        alpha_arr = jnp.ones((C,), jnp.float32)
    elif isinstance(alpha, (float, int)):
        alpha_arr = jnp.array([float(alpha), 1.0 - float(alpha)], jnp.float32)
    else:
        alpha_arr = jnp.asarray(alpha, jnp.float32).reshape(-1)
    if alpha_arr.shape[0] != C:
        raise ValueError("alpha must have one entry per class")
    alpha_rep = jnp.broadcast_to(alpha_arr.reshape(C, 1), (C, L))

    # Row tiling of the (R, L) = (ceil(M/128), 128) sample layout.
    R = pl.cdiv(M, L)
    tr_cap = max(8, (max_tile_bytes // (C * L * itemsize)) // 8 * 8)
    tr = int(min(_round_up(R, 8), tr_cap))
    ntiles = int(pl.cdiv(R, tr))
    R_pad = ntiles * tr
    M_pad = R_pad * L

    # Padding: -inf logits contribute exp(-inf)=0 to the logsumexp; target -1
    # matches no class so padded loss terms are exactly zero (no masks).
    x3 = jnp.pad(xT, ((0, 0), (0, M_pad - M)),
                 constant_values=float("-inf")).reshape(C, R_pad, L)
    tgt2 = jnp.pad(tgt_flat, (0, M_pad - M),
                   constant_values=-1).reshape(R_pad, L)

    # VMEM budget from the actual part (v7x: 64 MiB -> ~48 MiB usable;
    # v5e/v6e: 128 MiB -> ~96 MiB), using true padded buffer sizes.
    try:
        vmem_cap = int(pltpu.get_tpu_info().vmem_capacity_bytes)
    except Exception:  # conservative fallback
        vmem_cap = 64 << 20
    budget = (vmem_cap * 3) // 4

    x_block = C * tr * L * itemsize
    tgt_block = tr * L * 4
    small = (3 * _round_up(C, 8) + 8) * L * 4            # (C,128) scratch + out
    fixed = (2 * x_block + 2 * tgt_block                 # double-buffered streams
             + 4 * x_block                               # compiler temporaries
             + small + (1 << 20))
    cache_bytes = 2 * R_pad * L * 4                      # gx + alpha row caches
    cache_rows = (fixed + cache_bytes) <= budget
    vmem_need = fixed + (cache_bytes if cache_rows else 0)
    vmem_limit = int(min(vmem_cap - (4 << 20),
                         max(vmem_need + (4 << 20), 32 << 20)))

    if cache_rows:
        x_index_map = lambda p, i: (0, i * (1 - p), 0)   # phase 1 pins block 0
        cache_shape = (R_pad, L)
    else:
        x_index_map = lambda p, i: (0, i, 0)             # phase 1 re-streams x
        cache_shape = (8, L)

    kernel = functools.partial(_focal_loss_kernel, num_classes=C, tr=tr,
                               gamma=gamma, cache_rows=cache_rows)

    bytes_accessed = int(C * M_pad * itemsize * (1 if cache_rows else 2)
                         + 2 * M_pad * 4 + (C + 8) * L * 4)
    cost = pl.CostEstimate(flops=int((8 * C + 16) * M),
                           transcendentals=int((C + 2) * M),
                           bytes_accessed=bytes_accessed)

    partial_sums = pl.pallas_call(
        kernel,
        out_shape=jax.ShapeDtypeStruct((8, L), jnp.float32),
        grid_spec=pltpu.PrefetchScalarGridSpec(
            num_scalar_prefetch=0,
            grid=(2, ntiles),
            in_specs=[
                pl.BlockSpec((C, tr, L), x_index_map),          # logits (C,R,L)
                pl.BlockSpec((tr, L), lambda p, i: (i, 0)),     # targets
                pl.BlockSpec((C, L), lambda p, i: (0, 0)),      # alpha (resident)
            ],
            out_specs=pl.BlockSpec((8, L), lambda p, i: (0, 0)),
            scratch_shapes=[
                pltpu.VMEM((C, L), jnp.float32),       # running per-class/lane max
                pltpu.VMEM((C, L), jnp.float32),       # running per-class/lane sumexp
                pltpu.VMEM((C, L), jnp.float32),       # combined per-class lse
                pltpu.VMEM(cache_shape, jnp.float32),  # gathered-logit row cache
                pltpu.VMEM(cache_shape, jnp.float32),  # gathered-alpha row cache
            ],
        ),
        compiler_params=pltpu.CompilerParams(
            dimension_semantics=("arbitrary", "arbitrary"),
            vmem_limit_bytes=vmem_limit),
        cost_estimate=cost,
    )(x3, tgt2, alpha_rep)

    total = jnp.sum(partial_sums)       # tiny (8,128) epilogue reduce in XLA
    return total / M if size_average else total


def _reference(x, target, alpha, gamma=2, size_average=True):
    N, C, H, W = x.shape
    x2d = jnp.transpose(x.reshape(N, C, H * W), (0, 2, 1)).reshape(-1, C)
    tgt = target.reshape(-1)
    logpt_full = jax.nn.log_softmax(x2d.astype(jnp.float32), axis=0)  # dim=0!
    logpt = jnp.take_along_axis(logpt_full, tgt[:, None], axis=1)[:, 0]
    pt = jnp.exp(logpt)
    if alpha is not None:
        at = jnp.asarray(alpha, jnp.float32)[tgt]
        logpt = logpt * at
    loss = -1.0 * (1.0 - pt) ** gamma * logpt
    return jnp.mean(loss) if size_average else jnp.sum(loss)


if __name__ == "__main__":
    key = jax.random.PRNGKey(0)
    kx, kt = jax.random.split(key)

    N, C, H, W = 2, 4, 16, 16
    x = jax.random.normal(kx, (N, C, H, W), dtype=jnp.float32)
    target = jax.random.randint(kt, (N, H, W), 0, C, dtype=jnp.int32)
    alpha = jnp.array([0.1, 0.2, 0.3, 0.4], dtype=jnp.float32)
    gamma = 2

    loss = focal_loss(x, target, alpha, gamma=gamma, size_average=True)
    loss = jax.block_until_ready(loss)

    ref = _reference(x, target, alpha, gamma=gamma, size_average=True)
    np.testing.assert_allclose(np.asarray(loss), np.asarray(ref),
                               rtol=1e-5, atol=1e-5)
    print("KERNEL_OK")
</pallas_src>

<mosaic_0001>
module attributes {stable_mosaic.version = 11 : i64} {
  func.func @_focal_loss_kernel(%arg0: i32, %arg1: i32, %arg2: memref<4x8x128xf32, #tpu.memory_space<vmem>>, %arg3: memref<8x128xi32, #tpu.memory_space<vmem>>, %arg4: memref<4x128xf32, #tpu.memory_space<vmem>>, %arg5: memref<8x128xf32, #tpu.memory_space<vmem>>, %arg6: memref<4x128xf32, #tpu.memory_space<vmem>>, %arg7: memref<4x128xf32, #tpu.memory_space<vmem>>, %arg8: memref<4x128xf32, #tpu.memory_space<vmem>>, %arg9: memref<8x128xf32, #tpu.memory_space<vmem>>, %arg10: memref<8x128xf32, #tpu.memory_space<vmem>>) attributes {dimension_semantics = [#tpu.dimension_semantics<arbitrary>, #tpu.dimension_semantics<arbitrary>], iteration_bounds = array<i64: 2, 1>, scalar_prefetch = 0 : i64, scratch_operands = 5 : i64, tpu.core_type = #tpu.core_type<tc>, window_params = [{transform_indices = @transform_0, window_bounds = array<i64: 4, 8, 128>}, {transform_indices = @transform_1, window_bounds = array<i64: 8, 128>}, {pipeline_mode = #tpu.pipeline_mode<synchronous>, transform_indices = @transform_2, window_bounds = array<i64: 4, 128>}, {pipeline_mode = #tpu.pipeline_mode<synchronous>, transform_indices = @transform_3, window_bounds = array<i64: 8, 128>}]} {
    %c0_i32 = arith.constant 0 : i32
    %0 = arith.cmpi eq, %arg0, %c0_i32 : i32
    %c0_i32_0 = arith.constant 0 : i32
    %1 = arith.cmpi eq, %arg1, %c0_i32_0 : i32
    %2 = arith.andi %0, %1 : i1
    %3 = arith.extui %2 : i1 to i32
    %c0_i32_1 = arith.constant 0 : i32
    %4 = arith.cmpi ne, %3, %c0_i32_1 : i32
    scf.if %4 {
      %cst_5 = arith.constant 0xFF800000 : f32
      %11 = vector.broadcast %cst_5 : f32 to vector<4x128xf32>
      %c0 = arith.constant 0 : index
      %c0_6 = arith.constant 0 : index
      %12 = vector.load %arg6[%c0, %c0_6] : memref<4x128xf32, #tpu.memory_space<vmem>>, vector<4x128xf32>
      tpu.vector_store %arg6[%c0, %c0_6], %11 {strides = array<i32>} : memref<4x128xf32, #tpu.memory_space<vmem>>, vector<4x128xf32>,
      %cst_7 = arith.constant 0.000000e+00 : f32
      %13 = vector.broadcast %cst_7 : f32 to vector<4x128xf32>
      %c0_8 = arith.constant 0 : index
      %c0_9 = arith.constant 0 : index
      %14 = vector.load %arg7[%c0_8, %c0_9] : memref<4x128xf32, #tpu.memory_space<vmem>>, vector<4x128xf32>
      tpu.vector_store %arg7[%c0_8, %c0_9], %13 {strides = array<i32>} : memref<4x128xf32, #tpu.memory_space<vmem>>, vector<4x128xf32>,
    } else {
    }
    %c0_i32_2 = arith.constant 0 : i32
    %5 = arith.cmpi eq, %arg0, %c0_i32_2 : i32
    %6 = arith.extui %5 : i1 to i32
    %cst = arith.constant 0xFF800000 : f32
    %c0_i32_3 = arith.constant 0 : i32
    %7 = arith.cmpi ne, %6, %c0_i32_3 : i32
    scf.if %7 {
      %c0 = arith.constant 0 : index
      %c0_5 = arith.constant 0 : index
      %c0_6 = arith.constant 0 : index
      %11 = vector.load %arg2[%c0, %c0_5, %c0_6] : memref<4x8x128xf32, #tpu.memory_space<vmem>>, vector<4x8x128xf32>
      %cst_7 = arith.constant dense<0xFF800000> : vector<4x128xf32>
      %12 = vector.multi_reduction <maximumf>, %11, %cst_7 [1] : vector<4x8x128xf32> to vector<4x128xf32>
      %c0_8 = arith.constant 0 : index
      %c0_9 = arith.constant 0 : index
      %13 = vector.load %arg6[%c0_8, %c0_9] : memref<4x128xf32, #tpu.memory_space<vmem>>, vector<4x128xf32>
      %14 = arith.maximumf %13, %12 : vector<4x128xf32>
      %15 = vector.broadcast %cst : f32 to vector<4x128xf32>
      %16 = arith.cmpf oeq, %14, %15 : vector<4x128xf32>
      %cst_10 = arith.constant 0.000000e+00 : f32
      %17 = vector.broadcast %cst_10 : f32 to vector<4x128xf32>
      %18 = arith.select %16, %17, %14 : vector<4x128xi1>, vector<4x128xf32>
      %c0_11 = arith.constant 0 : index
      %c0_12 = arith.constant 0 : index
      %19 = vector.load %arg7[%c0_11, %c0_12] : memref<4x128xf32, #tpu.memory_space<vmem>>, vector<4x128xf32>
      %c0_13 = arith.constant 0 : index
      %c0_14 = arith.constant 0 : index
      %20 = vector.load %arg6[%c0_13, %c0_14] : memref<4x128xf32, #tpu.memory_space<vmem>>, vector<4x128xf32>
      %21 = arith.subf %20, %18 : vector<4x128xf32>
      %22 = math.exp %21 : vector<4x128xf32>
      %23 = arith.mulf %19, %22 : vector<4x128xf32>
      %24 = vector.shape_cast %18 : vector<4x128xf32> to vector<4x1x128xf32>
      %25 = vector.broadcast %24 : vector<4x1x128xf32> to vector<4x8x128xf32>
      %26 = arith.subf %11, %25 : vector<4x8x128xf32>
      %27 = math.exp %26 : vector<4x8x128xf32>
      %cst_15 = arith.constant dense<0.000000e+00> : vector<4x128xf32>
      %28 = vector.multi_reduction <add>, %27, %cst_15 [1] : vector<4x8x128xf32> to vector<4x128xf32>
      %29 = arith.addf %23, %28 : vector<4x128xf32>
      %c0_16 = arith.constant 0 : index
      %c0_17 = arith.constant 0 : index
      %30 = vector.load %arg7[%c0_16, %c0_17] : memref<4x128xf32, #tpu.memory_space<vmem>>, vector<4x128xf32>
      tpu.vector_store %arg7[%c0_16, %c0_17], %29 {strides = array<i32>} : memref<4x128xf32, #tpu.memory_space<vmem>>, vector<4x128xf32>,
      %c0_18 = arith.constant 0 : index
      %c0_19 = arith.constant 0 : index
      %31 = vector.load %arg6[%c0_18, %c0_19] : memref<4x128xf32, #tpu.memory_space<vmem>>, vector<4x128xf32>
      tpu.vector_store %arg6[%c0_18, %c0_19], %14 {strides = array<i32>} : memref<4x128xf32, #tpu.memory_space<vmem>>, vector<4x128xf32>,
      %c0_20 = arith.constant 0 : index
      %c0_21 = arith.constant 0 : index
      %32 = vector.load %arg3[%c0_20, %c0_21] : memref<8x128xi32, #tpu.memory_space<vmem>>, vector<8x128xi32>
      %c0_22 = arith.constant 0 : index
      %c0_23 = arith.constant 0 : index
      %33 = vector.load %arg4[%c0_22, %c0_23] : memref<4x128xf32, #tpu.memory_space<vmem>>, vector<4x128xf32>
      %cst_24 = arith.constant 0.000000e+00 : f32
      %34 = vector.broadcast %cst_24 : f32 to vector<8x128xf32>
      %cst_25 = arith.constant 0.000000e+00 : f32
      %35 = vector.broadcast %cst_25 : f32 to vector<8x128xf32>
      %c0_i32_26 = arith.constant 0 : i32
      %36 = vector.broadcast %c0_i32_26 : i32 to vector<8x128xi32>
      %37 = arith.cmpi eq, %32, %36 : vector<8x128xi32>
      %38 = vector.extract_strided_slice %11 {offsets = [0, 0, 0], sizes = [1, 8, 128], strides = [1, 1, 1]} : vector<4x8x128xf32> to vector<1x8x128xf32>
      %39 = vector.shape_cast %38 : vector<1x8x128xf32> to vector<8x128xf32>
      %40 = arith.select %37, %39, %34 : vector<8x128xi1>, vector<8x128xf32>
      %41 = vector.extract_strided_slice %33 {offsets = [0, 0], sizes = [1, 128], strides = [1, 1]} : vector<4x128xf32> to vector<1x128xf32>
      %42 = vector.shape_cast %41 : vector<1x128xf32> to vector<1x128xf32>
      %43 = vector.broadcast %42 : vector<1x128xf32> to vector<8x128xf32>
      %44 = arith.select %37, %43, %35 : vector<8x128xi1>, vector<8x128xf32>
      %c1_i32_27 = arith.constant 1 : i32
      %45 = vector.broadcast %c1_i32_27 : i32 to vector<8x128xi32>
      %46 = arith.cmpi eq, %32, %45 : vector<8x128xi32>
      %47 = vector.extract_strided_slice %11 {offsets = [1, 0, 0], sizes = [1, 8, 128], strides = [1, 1, 1]} : vector<4x8x128xf32> to vector<1x8x128xf32>
      %48 = vector.shape_cast %47 : vector<1x8x128xf32> to vector<8x128xf32>
      %49 = arith.select %46, %48, %40 : vector<8x128xi1>, vector<8x128xf32>
      %50 = vector.extract_strided_slice %33 {offsets = [1, 0], sizes = [1, 128], strides = [1, 1]} : vector<4x128xf32> to vector<1x128xf32>
      %51 = vector.shape_cast %50 : vector<1x128xf32> to vector<1x128xf32>
      %52 = vector.broadcast %51 : vector<1x128xf32> to vector<8x128xf32>
      %53 = arith.select %46, %52, %44 : vector<8x128xi1>, vector<8x128xf32>
      %c2_i32 = arith.constant 2 : i32
      %54 = vector.broadcast %c2_i32 : i32 to vector<8x128xi32>
      %55 = arith.cmpi eq, %32, %54 : vector<8x128xi32>
      %56 = vector.extract_strided_slice %11 {offsets = [2, 0, 0], sizes = [1, 8, 128], strides = [1, 1, 1]} : vector<4x8x128xf32> to vector<1x8x128xf32>
      %57 = vector.shape_cast %56 : vector<1x8x128xf32> to vector<8x128xf32>
      %58 = arith.select %55, %57, %49 : vector<8x128xi1>, vector<8x128xf32>
      %59 = vector.extract_strided_slice %33 {offsets = [2, 0], sizes = [1, 128], strides = [1, 1]} : vector<4x128xf32> to vector<1x128xf32>
      %60 = vector.shape_cast %59 : vector<1x128xf32> to vector<1x128xf32>
      %61 = vector.broadcast %60 : vector<1x128xf32> to vector<8x128xf32>
      %62 = arith.select %55, %61, %53 : vector<8x128xi1>, vector<8x128xf32>
      %c3_i32 = arith.constant 3 : i32
      %63 = vector.broadcast %c3_i32 : i32 to vector<8x128xi32>
      %64 = arith.cmpi eq, %32, %63 : vector<8x128xi32>
      %65 = vector.extract_strided_slice %11 {offsets = [3, 0, 0], sizes = [1, 8, 128], strides = [1, 1, 1]} : vector<4x8x128xf32> to vector<1x8x128xf32>
      %66 = vector.shape_cast %65 : vector<1x8x128xf32> to vector<8x128xf32>
      %67 = arith.select %64, %66, %58 : vector<8x128xi1>, vector<8x128xf32>
      %68 = vector.extract_strided_slice %33 {offsets = [3, 0], sizes = [1, 128], strides = [1, 1]} : vector<4x128xf32> to vector<1x128xf32>
      %69 = vector.shape_cast %68 : vector<1x128xf32> to vector<1x128xf32>
      %70 = vector.broadcast %69 : vector<1x128xf32> to vector<8x128xf32>
      %71 = arith.select %64, %70, %62 : vector<8x128xi1>, vector<8x128xf32>
      %c8_i32 = arith.constant 8 : i32
      %72 = arith.muli %arg1, %c8_i32 : i32
      %73 = tpu.assume_multiple %72, 8 : i32
      %74 = arith.index_cast %73 : i32 to index
      %c0_28 = arith.constant 0 : index
      %75 = vector.load %arg9[%74, %c0_28] : memref<8x128xf32, #tpu.memory_space<vmem>>, vector<8x128xf32>
      tpu.vector_store %arg9[%74, %c0_28], %67 {strides = array<i32>} : memref<8x128xf32, #tpu.memory_space<vmem>>, vector<8x128xf32>,
      %76 = arith.index_cast %73 : i32 to index
      %c0_29 = arith.constant 0 : index
      %77 = vector.load %arg10[%76, %c0_29] : memref<8x128xf32, #tpu.memory_space<vmem>>, vector<8x128xf32>
      tpu.vector_store %arg10[%76, %c0_29], %71 {strides = array<i32>} : memref<8x128xf32, #tpu.memory_space<vmem>>, vector<8x128xf32>,
    } else {
    }
    %c1_i32 = arith.constant 1 : i32
    %8 = arith.cmpi eq, %arg0, %c1_i32 : i32
    %9 = arith.extui %8 : i1 to i32
    %c0_i32_4 = arith.constant 0 : i32
    %10 = arith.cmpi ne, %9, %c0_i32_4 : i32
    scf.if %10 {
      %c0_i32_5 = arith.constant 0 : i32
      %11 = arith.cmpi eq, %arg1, %c0_i32_5 : i32
      %12 = arith.extui %11 : i1 to i32
      %c0_i32_6 = arith.constant 0 : i32
      %13 = arith.cmpi ne, %12, %c0_i32_6 : i32
      scf.if %13 {
        %c0_23 = arith.constant 0 : index
        %c0_24 = arith.constant 0 : index
        %63 = vector.load %arg6[%c0_23, %c0_24] : memref<4x128xf32, #tpu.memory_space<vmem>>, vector<4x128xf32>
        %cst_25 = arith.constant dense<0xFF800000> : vector<4xf32>
        %64 = vector.multi_reduction <maximumf>, %63, %cst_25 [1] : vector<4x128xf32> to vector<4xf32>
        %65 = vector.shape_cast %64 : vector<4xf32> to vector<4x1xf32>
        %c0_26 = arith.constant 0 : index
        %c0_27 = arith.constant 0 : index
        %66 = vector.load %arg7[%c0_26, %c0_27] : memref<4x128xf32, #tpu.memory_space<vmem>>, vector<4x128xf32>
        %c0_28 = arith.constant 0 : index
        %c0_29 = arith.constant 0 : index
        %67 = vector.load %arg6[%c0_28, %c0_29] : memref<4x128xf32, #tpu.memory_space<vmem>>, vector<4x128xf32>
        %68 = vector.broadcast %65 : vector<4x1xf32> to vector<4x128xf32>
        %69 = arith.subf %67, %68 : vector<4x128xf32>
        %70 = math.exp %69 : vector<4x128xf32>
        %71 = arith.mulf %66, %70 : vector<4x128xf32>
        %cst_30 = arith.constant dense<0.000000e+00> : vector<4xf32>
        %72 = vector.multi_reduction <add>, %71, %cst_30 [1] : vector<4x128xf32> to vector<4xf32>
        %73 = vector.shape_cast %72 : vector<4xf32> to vector<4x1xf32>
        %74 = math.log %73 : vector<4x1xf32>
        %75 = arith.addf %65, %74 : vector<4x1xf32>
        %76 = vector.shape_cast %75 : vector<4x1xf32> to vector<4x1xf32>
        %77 = vector.broadcast %76 : vector<4x1xf32> to vector<4x128xf32>
        %c0_31 = arith.constant 0 : index
        %c0_32 = arith.constant 0 : index
        %78 = vector.load %arg8[%c0_31, %c0_32] : memref<4x128xf32, #tpu.memory_space<vmem>>, vector<4x128xf32>
        tpu.vector_store %arg8[%c0_31, %c0_32], %77 {strides = array<i32>} : memref<4x128xf32, #tpu.memory_space<vmem>>, vector<4x128xf32>,
        %cst_33 = arith.constant 0.000000e+00 : f32
        %79 = vector.broadcast %cst_33 : f32 to vector<8x128xf32>
        %c0_34 = arith.constant 0 : index
        %c0_35 = arith.constant 0 : index
        %80 = vector.load %arg5[%c0_34, %c0_35] : memref<8x128xf32, #tpu.memory_space<vmem>>, vector<8x128xf32>
        tpu.vector_store %arg5[%c0_34, %c0_35], %79 {strides = array<i32>} : memref<8x128xf32, #tpu.memory_space<vmem>>, vector<8x128xf32>,
      } else {
      }
      %c0 = arith.constant 0 : index
      %c0_7 = arith.constant 0 : index
      %14 = vector.load %arg3[%c0, %c0_7] : memref<8x128xi32, #tpu.memory_space<vmem>>, vector<8x128xi32>
      %c0_8 = arith.constant 0 : index
      %c0_9 = arith.constant 0 : index
      %15 = vector.load %arg8[%c0_8, %c0_9] : memref<4x128xf32, #tpu.memory_space<vmem>>, vector<4x128xf32>
      %cst_10 = arith.constant 0.000000e+00 : f32
      %16 = vector.broadcast %cst_10 : f32 to vector<8x128xf32>
      %c0_i32_11 = arith.constant 0 : i32
      %17 = vector.broadcast %c0_i32_11 : i32 to vector<8x128xi32>
      %18 = arith.cmpi eq, %14, %17 : vector<8x128xi32>
      %19 = vector.extract_strided_slice %15 {offsets = [0, 0], sizes = [1, 128], strides = [1, 1]} : vector<4x128xf32> to vector<1x128xf32>
      %20 = vector.shape_cast %19 : vector<1x128xf32> to vector<1x128xf32>
      %21 = vector.broadcast %20 : vector<1x128xf32> to vector<8x128xf32>
      %22 = arith.select %18, %21, %16 : vector<8x128xi1>, vector<8x128xf32>
      %c1_i32_12 = arith.constant 1 : i32
      %23 = vector.broadcast %c1_i32_12 : i32 to vector<8x128xi32>
      %24 = arith.cmpi eq, %14, %23 : vector<8x128xi32>
      %25 = vector.extract_strided_slice %15 {offsets = [1, 0], sizes = [1, 128], strides = [1, 1]} : vector<4x128xf32> to vector<1x128xf32>
      %26 = vector.shape_cast %25 : vector<1x128xf32> to vector<1x128xf32>
      %27 = vector.broadcast %26 : vector<1x128xf32> to vector<8x128xf32>
      %28 = arith.select %24, %27, %22 : vector<8x128xi1>, vector<8x128xf32>
      %c2_i32 = arith.constant 2 : i32
      %29 = vector.broadcast %c2_i32 : i32 to vector<8x128xi32>
      %30 = arith.cmpi eq, %14, %29 : vector<8x128xi32>
      %31 = vector.extract_strided_slice %15 {offsets = [2, 0], sizes = [1, 128], strides = [1, 1]} : vector<4x128xf32> to vector<1x128xf32>
      %32 = vector.shape_cast %31 : vector<1x128xf32> to vector<1x128xf32>
      %33 = vector.broadcast %32 : vector<1x128xf32> to vector<8x128xf32>
      %34 = arith.select %30, %33, %28 : vector<8x128xi1>, vector<8x128xf32>
      %c3_i32 = arith.constant 3 : i32
      %35 = vector.broadcast %c3_i32 : i32 to vector<8x128xi32>
      %36 = arith.cmpi eq, %14, %35 : vector<8x128xi32>
      %37 = vector.extract_strided_slice %15 {offsets = [3, 0], sizes = [1, 128], strides = [1, 1]} : vector<4x128xf32> to vector<1x128xf32>
      %38 = vector.shape_cast %37 : vector<1x128xf32> to vector<1x128xf32>
      %39 = vector.broadcast %38 : vector<1x128xf32> to vector<8x128xf32>
      %40 = arith.select %36, %39, %34 : vector<8x128xi1>, vector<8x128xf32>
      %c8_i32 = arith.constant 8 : i32
      %41 = arith.muli %arg1, %c8_i32 : i32
      %42 = tpu.assume_multiple %41, 8 : i32
      %43 = arith.index_cast %42 : i32 to index
      %c0_13 = arith.constant 0 : index
      %44 = vector.load %arg9[%43, %c0_13] : memref<8x128xf32, #tpu.memory_space<vmem>>, vector<8x128xf32>
      %45 = arith.index_cast %42 : i32 to index
      %c0_14 = arith.constant 0 : index
      %46 = vector.load %arg10[%45, %c0_14] : memref<8x128xf32, #tpu.memory_space<vmem>>, vector<8x128xf32>
      %47 = arith.subf %44, %40 : vector<8x128xf32>
      %48 = math.exp %47 : vector<8x128xf32>
      %cst_15 = arith.constant 1.000000e+00 : f32
      %49 = vector.broadcast %cst_15 : f32 to vector<8x128xf32>
      %50 = arith.subf %49, %48 : vector<8x128xf32>
      %cst_16 = arith.constant 1.000000e+00 : f32
      %51 = vector.broadcast %cst_16 : f32 to vector<8x128xf32>
      %52 = arith.mulf %51, %50 : vector<8x128xf32>
      %53 = arith.mulf %52, %50 : vector<8x128xf32>
      %54 = arith.mulf %47, %46 : vector<8x128xf32>
      %55 = arith.mulf %53, %54 : vector<8x128xf32>
      %cst_17 = arith.constant 0.000000e+00 : f32
      %56 = vector.broadcast %cst_17 : f32 to vector<8x128xf32>
      %57 = arith.subf %56, %55 : vector<8x128xf32>
      %c0_18 = arith.constant 0 : index
      %c0_19 = arith.constant 0 : index
      %58 = vector.load %arg5[%c0_18, %c0_19] : memref<8x128xf32, #tpu.memory_space<vmem>>, vector<8x128xf32>
      %59 = vector.shape_cast %57 : vector<8x128xf32> to vector<1x8x128xf32>
      %cst_20 = arith.constant dense<0.000000e+00> : vector<8x128xf32>
      %60 = vector.multi_reduction <add>, %59, %cst_20 [0] : vector<1x8x128xf32> to vector<8x128xf32>
      %61 = arith.addf %58, %60 : vector<8x128xf32>
      %c0_21 = arith.constant 0 : index
      %c0_22 = arith.constant 0 : index
      %62 = vector.load %arg5[%c0_21, %c0_22] : memref<8x128xf32, #tpu.memory_space<vmem>>, vector<8x128xf32>
      tpu.vector_store %arg5[%c0_21, %c0_22], %61 {strides = array<i32>} : memref<8x128xf32, #tpu.memory_space<vmem>>, vector<8x128xf32>,
    } else {
    }
    return
  }
  func.func @transform_0(%arg0: i32, %arg1: i32) -> (i32, i32, i32) {
    %c1_i32 = arith.constant 1 : i32
    %0 = arith.subi %c1_i32, %arg0 : i32
    %1 = arith.muli %arg1, %0 : i32
    %c0_i32 = arith.constant 0 : i32
    %c0_i32_0 = arith.constant 0 : i32
    %c0_i32_1 = arith.constant 0 : i32
    return %c0_i32, %1, %c0_i32_0 : i32, i32, i32
  }
  func.func @transform_1(%arg0: i32, %arg1: i32) -> (i32, i32) {
    %c0_i32 = arith.constant 0 : i32
    %c0_i32_0 = arith.constant 0 : i32
    return %arg1, %c0_i32 : i32, i32
  }
  func.func @transform_2(%arg0: i32, %arg1: i32) -> (i32, i32) {
    %c0_i32 = arith.constant 0 : i32
    %c0_i32_0 = arith.constant 0 : i32
    %c0_i32_1 = arith.constant 0 : i32
    return %c0_i32, %c0_i32_0 : i32, i32
  }
  func.func @transform_3(%arg0: i32, %arg1: i32) -> (i32, i32) {
    %c0_i32 = arith.constant 0 : i32
    %c0_i32_0 = arith.constant 0 : i32
    %c0_i32_1 = arith.constant 0 : i32
    return %c0_i32, %c0_i32_0 : i32, i32
  }
}

</mosaic_0001>

<bundles_post_ra>
// kernel: tpu_custom_call.1
= control target key start
LH: loop header
LB: loop body
LE: loop exit
PB: predicated region body
PF: predicated region fallthrough
CT: control target
= control target key end

     0   :  { %8 = vsyncpa [#allocation8], 0  ;;  %s916_s0 = inlined_call_operand.hbm [shape: f32[4,8,128], index: 0, kind: input, shape index: {}]   ;;  %s917_s1 = inlined_call_operand.hbm [shape: s32[8,128], index: 1, kind: input, shape index: {}]   ;;  %s918_s2 = inlined_call_operand.hbm [shape: f32[4,128], index: 2, kind: input, shape index: {}]   ;;  %s919_s3 = inlined_call_operand.hbm [shape: f32[8,128], index: 3, kind: output, shape index: {}]  }
   0x1   :  { %10 = vsyncpa [#allocation8 + $0x1], 0 }
   0x2   :  { %11 = vsyncpa [#allocation11], 0 }
   0x3   :  { %12 = vsyncpa [#allocation9], 0  ;;  %s813_s12 = smov 0   ;;  %s815_s13 = smov 0  }
   0x4   :  { %s817_s14 = smov 0  }
   0x5 LB: > { %s528_s15 = sadd.s32 4294967295, %s783_s14   ;;  %s30_s16 = sadd.s32 1, %s779_s13  ;;  %s783_s14 = sphi %s817_s14, %s18_s14   ;;  %s779_s13 = sphi %s815_s13, %s923_s13   ;;  %s775_s12 = sphi %s813_s12, %s922_s12  }
   0x6   : > { %p32_p0 = scmp.ge.s32.totalorder %s30_s16, 2  ;;  %p529_p1 = scmp.ge.s32.totalorder %s783_s14, 1 }
   0x7   : > { %p133_p2 = scmp.lt.s32.totalorder %s783_s14, 3  ;;  %p840_p4 = scmp.eq.s32.totalorder %s528_s15, 0 }
   0x8   : > { %s925_s16 = smov (%p32_p0, %s30_s16), 0  ;;  %s147_s21 = sshll.u32 %s917_s1, 4  ;;  %s148_s21 = int_to_ptr.hbm [resolvable:$true] %s147_s21 }
   0x9   : > { %p834_p3 = pnand %p529_p1, %p133_p2  ;;  %s785_s22 = smov [#allocation10]  }
   0xa   : > { %s149_s23 = sshll.u32 %s785_s22, 4  ;;  %s159_s26 = sshll.u32 %s918_s2, 4  ;;  %s150_s23 = int_to_ptr.vmem [resolvable:$true] %s149_s23  ;;  %s160_s26 = int_to_ptr.hbm [resolvable:$true] %s159_s26 }
   0xb   : > { %p562_p5 = pneg %p834_p3  ;;  %p575_p7 = scmp.lt.s32.totalorder %s783_s14, 2 }
   0xc   : > { %s786_s27 = smov [#allocation12]   ;;  %p576_p8 = scmp.eq.s32.totalorder %s783_s14, 0 }
   0xd   : > { %p563_p6 = pnand %p840_p4, %p562_p5  ;;  %s161_s28 = sshll.u32 %s786_s27, 4  ;;  %s162_s28 = int_to_ptr.vmem [resolvable:$true] %s161_s28 }
   0xe   : > { %s183_s4 = sshll.u32 %s916_s0, 4  ;;  %s787_s5 = smov [#allocation7]   ;;  %s184_s4 = int_to_ptr.hbm [resolvable:$true] %s183_s4 }
   0xf   : > { %565 = dma.hbm_to_vmem [thread:$0]  (!%p563_p6), %s148_s21, 128, %s150_s23, [#allocation11]  }
  0x10   : > { %568 = dma.hbm_to_vmem [thread:$0]  (!%p563_p6), %s160_s26, 64, %s162_s28, [#allocation11]  }
  0x11   : > { %s185_s6 = sshll.u32 %s787_s5, 4  ;;  %p570_p9 = pnand %p576_p8, %p575_p7  ;;  %s186_s6 = int_to_ptr.vmem [resolvable:$true] %s185_s6 }
  0x12   : > { %s788_s7 = smov 128   ;;  %s789_s8 = smov 8  }
  0x13   : > { %572 = dma.hbm_to_vmem [thread:$0]  (!%p570_p9), %s184_s4, 512, %s186_s6, [#allocation8], %s788_s7, %s788_s7, %s789_s8  }
  0x14   : > { %197 = sbr.rel (%p834_p3) target bundleno = 401 (0x191), region = 32 }
  0x19   : > { %762 = dma.done.wait (%p840_p4), [#allocation8], 512  }
  0x1a   : > { %764 = vsyncadd (%p840_p4), [#allocation8], 4294966784 }
  0x1b   : > { %766 = dma.done.wait (%p840_p4), [#allocation11], 192  }
  0x1c   : > { %768 = vsyncadd (%p840_p4), [#allocation11], 4294967104  ;;  %p234_p10 = scmp.eq.s32.totalorder %s775_s12, 0 }
  0x1d   : > { %v790_v0 = vmov (%p234_p10), -inf   ;;  %v791_v1 = vmov (%p234_p10), 0.0  }
  0x1e   : > { %239 = sbr.rel (!%p234_p10) target bundleno = 35 (0x23), region = 48  ;;  %240 = vst [vmem:[#allocation2] sm:$0xf] (%p234_p10), %v790_v0 }
  0x1f   : > { %241 = vst [vmem:[#allocation3] sm:$0xf] (%p234_p10), %v791_v1 }
  0x23 PF: > { %p539_p11 = scmp.ne.s32.totalorder %s775_s12, 0 }
  0x25   : > { %244 = sbr.rel (%p539_p11) target bundleno = 95 (0x5f), region = 52 }
  0x2a   : > { %v871_v2 = vld [vmem:[#allocation7] sm:$0xff]  ;;  %v873_v3 = vld [vmem:[#allocation7 + $0x8] sm:$0xff]  ;;  %v875_v4 = vld [vmem:[#allocation7 + $0x10] sm:$0xff]  ;;  %vm278_vm0 = vcmask 1041409   ;;  %vm280_vm1 = vcmask 1042434   ;;  %vm282_vm2 = vcmask 1043459  }
  0x2b   : > { %v877_v5 = vld [vmem:[#allocation7 + $0x18] sm:$0xff]  ;;  %v249_v6 = vrot.slane %v871_v2, 4  ;;  %v255_v7 = vrot.slane %v873_v3, 4  ;;  %v261_v8 = vrot.slane %v875_v4, 4  ;;  %v273_v30 = vld [vmem:[#allocation2] sm:$0xf] }
  0x2c   : > { %v267_v9 = vrot.slane %v877_v5, 4  ;;  %v353_v32 = vld [vmem:[#allocation12] sm:$0xf]  ;;  %v352_v34 = vld [vmem:[#allocation10] sm:$0xff] }
  0x2d   : > { %v250_v10 = vmax.f32 %v871_v2, %v249_v6  ;;  %v256_v11 = vmax.f32 %v873_v3, %v255_v7  ;;  %v262_v12 = vmax.f32 %v875_v4, %v261_v8  ;;  %v356_v35 = vperm.slane %v353_v32, 0 }
  0x2e   : > { %v268_v13 = vmax.f32 %v877_v5, %v267_v9  ;;  %vm354_vm3 = vcmp.eq.s32.totalorder %v352_v34, 0  ;;  %v360_v37 = vperm.slane %v353_v32, 1  ;;  %vm358_vm4 = vcmp.eq.s32.totalorder %v352_v34, 1 }
  0x2f   : > { %v251_v14 = vrot.slane %v250_v10, 2  ;;  %v257_v15 = vrot.slane %v256_v11, 2  ;;  %v263_v16 = vrot.slane %v262_v12, 2  ;;  %v355_v39 = vsel %vm354_vm3, %v871_v2, 0.0 }
  0x30   : > { %v269_v17 = vrot.slane %v268_v13, 2  ;;  %v357_v40 = vsel %vm354_vm3, %v356_v35, 0.0  ;;  %v359_v41 = vsel %vm358_vm4, %v873_v3, %v355_v39  ;;  %vm362_vm5 = vcmp.eq.s32.totalorder %v352_v34, 2 }
  0x31   : > { %v252_v18 = vmax.f32 %v250_v10, %v251_v14  ;;  %v258_v19 = vmax.f32 %v256_v11, %v257_v15  ;;  %v264_v20 = vmax.f32 %v262_v12, %v263_v16  ;;  %v361_v42 = vsel %vm358_vm4, %v360_v37, %v357_v40 }
  0x32   : > { %v270_v21 = vmax.f32 %v268_v13, %v269_v17  ;;  %v364_v43 = vperm.slane %v353_v32, 2  ;;  %v363_v44 = vsel %vm362_vm5, %v875_v4, %v359_v41  ;;  %vm366_vm7 = vcmp.eq.s32.totalorder %v352_v34, 3 }
  0x33   : > { %v253_v22 = vrot.slane %v252_v18, 1  ;;  %v259_v23 = vrot.slane %v258_v19, 1  ;;  %v265_v24 = vrot.slane %v264_v20, 1  ;;  %v368_v45 = vperm.slane %v353_v32, 3 }
  0x34   : > { %v271_v25 = vrot.slane %v270_v21, 1  ;;  %v367_v47 = vsel %vm366_vm7, %v877_v5, %v363_v44  ;;  %v365_v48 = vsel %vm362_vm5, %v364_v43, %v361_v42 }
  0x35   : > { %v254_v26 = vmax.f32 %v252_v18, %v253_v22  ;;  %v260_v27 = vmax.f32 %v258_v19, %v259_v23  ;;  %v266_v28 = vmax.f32 %v264_v20, %v265_v24  ;;  %372 = vst [vmem:[#allocation5] sm:$0xff] %v367_v47  ;;  %v369_v53 = vsel %vm366_vm7, %v368_v45, %v365_v48  ;;  %v288_v24 = vld [vmem:[#allocation3] sm:$0xf] }
  0x36   : > { %v272_v29 = vmax.f32 %v270_v21, %v271_v25  ;;  %374 = vst [vmem:[#allocation6] sm:$0xff] %v369_v53 }
  0x37   : > { %v279_v31 = vsel %vm278_vm0, %v260_v27, %v254_v26 }
  0x38   : > { %v281_v33 = vsel %vm280_vm1, %v266_v28, %v279_v31 }
  0x39   : > { %v283_v36 = vsel %vm282_vm2, %v272_v29, %v281_v33 }
  0x3a   : > { %v285_v38 = vmax.f32 %v273_v30, %v283_v36 }
  0x3c   : > { %vm286_vm6 = vcmp.eq.f32.partialorder %v285_v38, -inf  ;;  %351 = vst [vmem:[#allocation2] sm:$0xf] %v285_v38 }
  0x3d   : > { %v287_v46 = vsel %vm286_vm6, 0.0, %v285_v38 }
  0x3e   : > { %v294_v49 = vrot.slane %v287_v46, 1  ;;  %v295_v50 = vrot.slane %v287_v46, 2  ;;  %v296_v51 = vrot.slane %v287_v46, 3  ;;  %v297_v52 = vperm.slane %v287_v46, 0 }
  0x3f   : > { %v289_v1 = vsub.f32 %v273_v30, %v287_v46 }
  0x40   : > { %v298_v54 = vperm.slane %v294_v49, 0  ;;  %v299_v55 = vperm.slane %v295_v50, 0  ;;  %v300_v56 = vperm.slane %v296_v51, 0  ;;  %v305_v57 = vsub.f32 %v871_v2, %v297_v52 }
  0x41   : > { %v290_v7 = vmul.f32 1.442695, %v289_v1 }
  0x42   : > { %v306_v58 = vsub.f32 %v873_v3, %v298_v54  ;;  %v307_v59 = vsub.f32 %v875_v4, %v299_v55  ;;  %v308_v60 = vsub.f32 %v877_v5, %v300_v56  ;;  %v309_v61 = vmul.f32 1.442695, %v305_v57 }
  0x44   : > { %v311_v62 = vmul.f32 1.442695, %v306_v58  ;;  %v313_v63 = vmul.f32 1.442695, %v307_v59  ;;  %v315_v0 = vmul.f32 1.442695, %v308_v60  ;;  %615 = vpow2.f32 %v309_v61 }
  0x46   : > { %617 = vpow2.f32 %v311_v62 }
  0x47   : > { %619 = vpow2.f32 %v313_v63 }
  0x48   : > { %621 = vpow2.f32 %v315_v0 }
  0x49   : > { %623 = vpow2.f32 %v290_v7 }
  0x4a   : > { %v616_v6 = vpop.eup %615 }
  0x4b   : > { %v317_v9 = vrot.slane %v616_v6, 4 }
  0x4c   : > { %v618_v8 = vpop.eup %617 }
  0x4d   : > { %v620_v2 = vpop.eup %619  ;;  %v323_v10 = vrot.slane %v618_v8, 4  ;;  %v318_v11 = vadd.f32 %v616_v6, %v317_v9 }
  0x4e   : > { %v622_v3 = vpop.eup %621  ;;  %v329_v4 = vrot.slane %v620_v2, 4 }
  0x4f   : > { %v324_v5 = vadd.f32 %v618_v8, %v323_v10  ;;  %v335_v12 = vrot.slane %v622_v3, 4  ;;  %v319_v13 = vrot.slane %v318_v11, 2  ;;  %v624_v23 = vpop.eup %623 }
  0x50   : > { %v330_v14 = vadd.f32 %v620_v2, %v329_v4  ;;  %v292_v31 = vmul.f32 %v624_v23, %v288_v24 }
  0x51   : > { %v325_v15 = vrot.slane %v324_v5, 2  ;;  %v336_v16 = vadd.f32 %v622_v3, %v335_v12  ;;  %v320_v17 = vadd.f32 %v319_v13, %v318_v11 }
  0x52   : > { %v331_v18 = vrot.slane %v330_v14, 2 }
  0x53   : > { %v326_v19 = vadd.f32 %v325_v15, %v324_v5  ;;  %v337_v20 = vrot.slane %v336_v16, 2  ;;  %v321_v21 = vrot.slane %v320_v17, 1 }
  0x54   : > { %v332_v22 = vadd.f32 %v331_v18, %v330_v14 }
  0x55   : > { %v327_v25 = vrot.slane %v326_v19, 1  ;;  %v338_v26 = vadd.f32 %v337_v20, %v336_v16  ;;  %v322_v27 = vadd.f32 %v321_v21, %v320_v17 }
  0x56   : > { %v333_v28 = vrot.slane %v332_v22, 1 }
  0x57   : > { %v328_v29 = vadd.f32 %v327_v25, %v326_v19  ;;  %v339_v30 = vrot.slane %v338_v26, 1 }
  0x58   : > { %v334_v32 = vadd.f32 %v333_v28, %v332_v22 }
  0x59   : > { %v340_v33 = vadd.f32 %v339_v30, %v338_v26  ;;  %v345_v34 = vsel %vm278_vm0, %v328_v29, %v322_v27 }
  0x5a   : > { %v346_v35 = vsel %vm280_vm1, %v334_v32, %v345_v34 }
  0x5b   : > { %v347_v36 = vsel %vm282_vm2, %v340_v33, %v346_v35 }
  0x5c   : > { %v349_v37 = vadd.f32 %v347_v36, %v292_v31 }
  0x5e   : > { %350 = vst [vmem:[#allocation3] sm:$0xf] %v349_v37 }
  0x5f PF: > { %p540_p12 = scmp.ne.s32.totalorder %s775_s12, 1 }
  0x61   : > { %378 = sbr.rel (%p540_p12) target bundleno = 395 (0x18b), region = 56 }
  0x66   : > { %v382_v38 = vld [vmem:[#allocation2] sm:$0xf]  ;;  %vm383_vm8 = vcmask 1043456   ;;  %v387_v43 = vld [vmem:[#allocation3] sm:$0xf]  ;;  %v416_v57 = vld [vmem:[#allocation5] sm:$0xff] }
  0x67   : > { %v384_v39 = vsel %vm383_vm8, %v382_v38, -inf  ;;  %v400_v51 = vld [vmem:[#allocation10] sm:$0xff]  ;;  %v418_v1 = vld [vmem:[#allocation6] sm:$0xff] }
  0x68   : > { %385 = vmax.xlane.f32.xlu0 %v384_v39  ;;  %vm402_vm9 = vcmp.eq.s32.totalorder %v400_v51, 0  ;;  %vm405_vm10 = vcmp.eq.s32.totalorder %v400_v51, 1  ;;  %vm408_vm11 = vcmp.eq.s32.totalorder %v400_v51, 2  ;;  %vm411_vm12 = vcmp.eq.s32.totalorder %v400_v51, 3 }
  0xdb   : > { %v386_v40 = vpop.xlane.xlu0 %385 }
  0xdc   : > { %v388_v41 = vsub.f32 %v382_v38, %v386_v40 }
  0xde   : > { %v389_v42 = vmul.f32 1.442695, %v388_v41 }
  0xe0   : > { %625 = vpow2.f32 %v389_v42 }
  0xe6   : > { %v626_v44 = vpop.eup %625 }
  0xe7   : > { %v391_v45 = vmul.f32 %v626_v44, %v387_v43 }
  0xe9   : > { %v392_v46 = vsel %vm383_vm8, %v391_v45, 0.0 }
  0xea   : > { %393 = vadd.xlane.f32.xlu0 %v392_v46 }
 0x15d   : > { %v394_v47 = vpop.xlane.xlu0 %393 }
 0x15e   : > { %627 = vlog2.f32 %v394_v47 }
 0x164   : > { %v628_v48 = vpop.eup %627 }
 0x165   : > { %v396_v49 = vmul.f32 0.6931472, %v628_v48 }
 0x167   : > { %v397_v50 = vadd.f32 %v396_v49, %v386_v40 }
 0x169   : > { %398 = vst [vmem:[#allocation4] sm:$0xf] %v397_v50 }
 0x170   : > { %v401_v52 = vld [vmem:[#allocation4] sm:$0xf] }
 0x171   : > { %v403_v53 = vperm.slane %v401_v52, 0  ;;  %v406_v54 = vperm.slane %v401_v52, 1  ;;  %v409_v56 = vperm.slane %v401_v52, 2  ;;  %v412_v59 = vperm.slane %v401_v52, 3 }
 0x173   : > { %v404_v55 = vsel %vm402_vm9, %v403_v53, 0.0 }
 0x174   : > { %v407_v58 = vsel %vm405_vm10, %v406_v54, %v404_v55 }
 0x175   : > { %v410_v60 = vsel %vm408_vm11, %v409_v56, %v407_v58 }
 0x176   : > { %v413_v61 = vsel %vm411_vm12, %v412_v59, %v410_v60 }
 0x177   : > { %v419_v62 = vsub.f32 %v416_v57, %v413_v61 }
 0x179   : > { %v420_v63 = vmul.f32 1.442695, %v419_v62  ;;  %v424_v8 = vmul.f32 %v419_v62, %v418_v1 }
 0x17b   : > { %629 = vpow2.f32 %v420_v63 }
 0x181   : > { %v630_v0 = vpop.eup %629 }
 0x182   : > { %v422_v6 = vsub.f32 1.0, %v630_v0 }
 0x184   : > { %v423_v7 = vmul.f32 %v422_v6, %v422_v6 }
 0x186   : > { %v425_v9 = vmul.f32 %v424_v8, %v423_v7 }
 0x188   : > { %v426_v2 = vsub.f32 0.0, %v425_v9 }
 0x18a   : > { %430 = vst [vmem:[#allocation13] sm:$0xff] %v426_v2 }
 0x18b PF: > { %p580_p13 = scmp.eq.s32.totalorder %s528_s15, 1  ;;  %s439_s11 = sshll.u32 %s919_s3, 4  ;;  %s440_s11 = int_to_ptr.hbm [resolvable:$true] %s439_s11 }
 0x18c   : > { %s792_s12 = smov [#allocation13]  }
 0x18d   : > { %s437_s17 = sshll.u32 %s792_s12, 4  ;;  %s438_s17 = int_to_ptr.vmem [resolvable:$true] %s437_s17 }
 0x18e   : > { %559 = dma.vmem_to_hbm [thread:$0]  (%p580_p13), %s438_s17, 128, %s440_s11, [#allocation9]  }
 0x18f   : > { %770 = dma.done.wait (%p580_p13), [#allocation9], 128  }
 0x190   : > { %772 = vsyncadd (%p580_p13), [#allocation9], 4294967168 }
 0x191 PF: > { %s18_s14 = sadd.s32 1, %s783_s14   ;;  %s922_s12 = smov %s779_s13 }
 0x192   : > { %p15_p0 = scmp.ge.s32.totalorder %s18_s14, 4   ;;  %s923_s13 = smov %s925_s16 }
 0x194   :  { %17 = sbr.rel (!%p15_p0) target bundleno = 5 (0x5), region = 98 }
 0x199   :  { %453 = vsyncpa [#allocation8], 1 }
 0x19a   :  { %455 = vsyncpa [#allocation8 + $0x1], 1 }
 0x19b   :  { %456 = vsyncpa [#allocation11], 1 }
 0x19c   :  { %457 = vsyncpa [#allocation9], 1 }
 0x19d   :  { %459 = vsyncpa [#allocation9 + $0x1], 1 }

</bundles_post_ra>
